<compile_context>
chip_gen: v7x
topology: tpu7x:2x2x1
jax: 0.10.0
libtpu: 0.0.40
codegen_flags: <defaults>
</compile_context>

<pallas_src>
import functools

import jax
import jax.numpy as jnp
from jax import lax
from jax.experimental import pallas as pl
from jax.experimental.pallas import tpu as pltpu

_C1 = 0.01 ** 2
_C2 = 0.03 ** 2


def _ssim_kernel(x_ref, y_ref, o_ref, *, H, W):
    """Fully fused SSIM loss for one (n, c) image plane.

    x_ref, y_ref: (1, H, W) f32 un-padded inputs.
    o_ref:        (1, H, W) f32 per-pixel loss = clamp((1 - SSIM)/2, 0, 1).
    """
    x = x_ref[0]  # (H, W)
    y = y_ref[0]

    def reflect_pad1(a):
        # ReflectionPad2d(1): index -1 mirrors index 1, index N mirrors N-2.
        a = jnp.concatenate([a[1:2, :], a, a[H - 2:H - 1, :]], axis=0)   # (H+2, W)
        a = jnp.concatenate([a[:, 1:2], a, a[:, W - 2:W - 1]], axis=1)   # (H+2, W+2)
        return a

    def box3(a):
        # Separable 3x3 box sum on a padded (H+2, W+2) plane -> (H, W).
        c = a[:, 0:W] + a[:, 1:W + 1] + a[:, 2:W + 2]                    # (H+2, W)
        return c[0:H, :] + c[1:H + 1, :] + c[2:H + 2, :]                 # (H, W)

    xp = reflect_pad1(x)
    yp = reflect_pad1(y)

    inv9 = jnp.float32(1.0 / 9.0)
    mu_x = box3(xp) * inv9
    mu_y = box3(yp) * inv9
    e_xx = box3(xp * xp) * inv9
    e_yy = box3(yp * yp) * inv9
    e_xy = box3(xp * yp) * inv9

    sigma_x = e_xx - mu_x * mu_x
    sigma_y = e_yy - mu_y * mu_y
    sigma_xy = e_xy - mu_x * mu_y

    ssim_n = (2.0 * mu_x * mu_y + _C1) * (2.0 * sigma_xy + _C2)
    ssim_d = (mu_x * mu_x + mu_y * mu_y + _C1) * (sigma_x + sigma_y + _C2)

    o_ref[0] = jnp.clip((1.0 - ssim_n / ssim_d) * 0.5, 0.0, 1.0)


def ssim(x_nchw, y_nchw):
    """Equivalent of SSIM().forward(x, y): (N,C,H,W) x2 -> (N,C,H,W) loss map."""
    N, C, H, W = x_nchw.shape
    nc = N * C
    # Leading-dim reshape is free (row-major); W stays on the lane axis.
    xf = x_nchw.reshape(nc, H, W).astype(jnp.float32)
    yf = y_nchw.reshape(nc, H, W).astype(jnp.float32)

    cost = pl.CostEstimate(
        flops=45 * nc * H * W,             # ~45 VPU ops / output pixel
        transcendentals=0,
        bytes_accessed=3 * nc * H * W * 4,  # read x, read y, write out
    )

    out = pl.pallas_call(
        functools.partial(_ssim_kernel, H=H, W=W),
        out_shape=jax.ShapeDtypeStruct((nc, H, W), jnp.float32),
        grid=(nc,),
        in_specs=[
            pl.BlockSpec((1, H, W), lambda i: (i, 0, 0)),
            pl.BlockSpec((1, H, W), lambda i: (i, 0, 0)),
        ],
        out_specs=pl.BlockSpec((1, H, W), lambda i: (i, 0, 0)),
        compiler_params=pltpu.CompilerParams(
            dimension_semantics=("parallel",)),
        cost_estimate=cost,
    )(xf, yf)
    return out.reshape(N, C, H, W)


def _ssim_ref(x, y):
    """Pure-JAX reference (reflect pad + reduce_window avg pool) for checking."""
    pad = ((0, 0), (0, 0), (1, 1), (1, 1))
    xr = jnp.pad(x, pad, mode="reflect")
    yr = jnp.pad(y, pad, mode="reflect")

    def avg_pool3(a):
        s = lax.reduce_window(a, 0.0, lax.add, (1, 1, 3, 3), (1, 1, 1, 1), "VALID")
        return s / 9.0

    mu_x = avg_pool3(xr)
    mu_y = avg_pool3(yr)
    sigma_x = avg_pool3(xr * xr) - mu_x ** 2
    sigma_y = avg_pool3(yr * yr) - mu_y ** 2
    sigma_xy = avg_pool3(xr * yr) - mu_x * mu_y
    n = (2.0 * mu_x * mu_y + _C1) * (2.0 * sigma_xy + _C2)
    d = (mu_x ** 2 + mu_y ** 2 + _C1) * (sigma_x + sigma_y + _C2)
    return jnp.clip((1.0 - n / d) * 0.5, 0.0, 1.0)


if __name__ == "__main__":
    key = jax.random.PRNGKey(0)
    kx, ky = jax.random.split(key)

    # Small image-like shapes (NCHW): batch=2, 3 channels, 16x16.
    N, C, H, W = 2, 3, 16, 16
    x = jax.random.uniform(kx, (N, C, H, W), dtype=jnp.float32)
    y = jax.random.uniform(ky, (N, C, H, W), dtype=jnp.float32)

    out = jax.jit(ssim)(x, y)
    out = jax.block_until_ready(out)

    assert out.shape == (N, C, H, W), out.shape
    assert bool(jnp.all(jnp.isfinite(out)))

    ref = _ssim_ref(x, y)
    max_err = float(jnp.max(jnp.abs(out - ref)))
    assert bool(jnp.allclose(out, ref, rtol=1e-5, atol=1e-5)), max_err

    print("KERNEL_OK")
</pallas_src>

<mosaic_0001>
module attributes {stable_mosaic.version = 11 : i64} {
  func.func @_ssim_kernel(%arg0: i32, %arg1: memref<1x16x16xf32, #tpu.memory_space<vmem>>, %arg2: memref<1x16x16xf32, #tpu.memory_space<vmem>>, %arg3: memref<1x16x16xf32, #tpu.memory_space<vmem>>) attributes {dimension_semantics = [#tpu.dimension_semantics<parallel>], iteration_bounds = array<i64: 6>, scalar_prefetch = 0 : i64, scratch_operands = 0 : i64, tpu.core_type = #tpu.core_type<tc>, window_params = [{transform_indices = @transform_0, window_bounds = array<i64: 1, 16, 16>}, {transform_indices = @transform_1, window_bounds = array<i64: 1, 16, 16>}, {transform_indices = @transform_2, window_bounds = array<i64: 1, 16, 16>}]} {
    %c0 = arith.constant 0 : index
    %c0_0 = arith.constant 0 : index
    %c0_1 = arith.constant 0 : index
    %0 = vector.load %arg1[%c0, %c0_0, %c0_1] : memref<1x16x16xf32, #tpu.memory_space<vmem>>, vector<1x16x16xf32>
    %1 = vector.shape_cast %0 : vector<1x16x16xf32> to vector<16x16xf32>
    %c0_2 = arith.constant 0 : index
    %c0_3 = arith.constant 0 : index
    %c0_4 = arith.constant 0 : index
    %2 = vector.load %arg2[%c0_2, %c0_3, %c0_4] : memref<1x16x16xf32, #tpu.memory_space<vmem>>, vector<1x16x16xf32>
    %3 = vector.shape_cast %2 : vector<1x16x16xf32> to vector<16x16xf32>
    %4 = vector.extract_strided_slice %1 {offsets = [1, 0], sizes = [1, 16], strides = [1, 1]} : vector<16x16xf32> to vector<1x16xf32>
    %5 = vector.extract_strided_slice %1 {offsets = [14, 0], sizes = [1, 16], strides = [1, 1]} : vector<16x16xf32> to vector<1x16xf32>
    %6 = tpu.concatenate %4, %1, %5 in 0 : vector<1x16xf32>, vector<16x16xf32>, vector<1x16xf32> -> vector<18x16xf32>
    %7 = vector.extract_strided_slice %6 {offsets = [0, 1], sizes = [18, 1], strides = [1, 1]} : vector<18x16xf32> to vector<18x1xf32>
    %8 = vector.extract_strided_slice %6 {offsets = [0, 14], sizes = [18, 1], strides = [1, 1]} : vector<18x16xf32> to vector<18x1xf32>
    %9 = tpu.concatenate %7, %6, %8 in 1 : vector<18x1xf32>, vector<18x16xf32>, vector<18x1xf32> -> vector<18x18xf32>
    %10 = vector.extract_strided_slice %3 {offsets = [1, 0], sizes = [1, 16], strides = [1, 1]} : vector<16x16xf32> to vector<1x16xf32>
    %11 = vector.extract_strided_slice %3 {offsets = [14, 0], sizes = [1, 16], strides = [1, 1]} : vector<16x16xf32> to vector<1x16xf32>
    %12 = tpu.concatenate %10, %3, %11 in 0 : vector<1x16xf32>, vector<16x16xf32>, vector<1x16xf32> -> vector<18x16xf32>
    %13 = vector.extract_strided_slice %12 {offsets = [0, 1], sizes = [18, 1], strides = [1, 1]} : vector<18x16xf32> to vector<18x1xf32>
    %14 = vector.extract_strided_slice %12 {offsets = [0, 14], sizes = [18, 1], strides = [1, 1]} : vector<18x16xf32> to vector<18x1xf32>
    %15 = tpu.concatenate %13, %12, %14 in 1 : vector<18x1xf32>, vector<18x16xf32>, vector<18x1xf32> -> vector<18x18xf32>
    %16 = vector.extract_strided_slice %9 {offsets = [0, 0], sizes = [18, 16], strides = [1, 1]} : vector<18x18xf32> to vector<18x16xf32>
    %17 = vector.extract_strided_slice %9 {offsets = [0, 1], sizes = [18, 16], strides = [1, 1]} : vector<18x18xf32> to vector<18x16xf32>
    %18 = arith.addf %16, %17 : vector<18x16xf32>
    %19 = vector.extract_strided_slice %9 {offsets = [0, 2], sizes = [18, 16], strides = [1, 1]} : vector<18x18xf32> to vector<18x16xf32>
    %20 = arith.addf %18, %19 : vector<18x16xf32>
    %21 = vector.extract_strided_slice %20 {offsets = [0, 0], sizes = [16, 16], strides = [1, 1]} : vector<18x16xf32> to vector<16x16xf32>
    %22 = vector.extract_strided_slice %20 {offsets = [1, 0], sizes = [16, 16], strides = [1, 1]} : vector<18x16xf32> to vector<16x16xf32>
    %23 = arith.addf %21, %22 : vector<16x16xf32>
    %24 = vector.extract_strided_slice %20 {offsets = [2, 0], sizes = [16, 16], strides = [1, 1]} : vector<18x16xf32> to vector<16x16xf32>
    %25 = arith.addf %23, %24 : vector<16x16xf32>
    %cst = arith.constant 0.111111112 : f32
    %26 = vector.broadcast %cst : f32 to vector<16x16xf32>
    %27 = arith.mulf %25, %26 : vector<16x16xf32>
    %28 = vector.extract_strided_slice %15 {offsets = [0, 0], sizes = [18, 16], strides = [1, 1]} : vector<18x18xf32> to vector<18x16xf32>
    %29 = vector.extract_strided_slice %15 {offsets = [0, 1], sizes = [18, 16], strides = [1, 1]} : vector<18x18xf32> to vector<18x16xf32>
    %30 = arith.addf %28, %29 : vector<18x16xf32>
    %31 = vector.extract_strided_slice %15 {offsets = [0, 2], sizes = [18, 16], strides = [1, 1]} : vector<18x18xf32> to vector<18x16xf32>
    %32 = arith.addf %30, %31 : vector<18x16xf32>
    %33 = vector.extract_strided_slice %32 {offsets = [0, 0], sizes = [16, 16], strides = [1, 1]} : vector<18x16xf32> to vector<16x16xf32>
    %34 = vector.extract_strided_slice %32 {offsets = [1, 0], sizes = [16, 16], strides = [1, 1]} : vector<18x16xf32> to vector<16x16xf32>
    %35 = arith.addf %33, %34 : vector<16x16xf32>
    %36 = vector.extract_strided_slice %32 {offsets = [2, 0], sizes = [16, 16], strides = [1, 1]} : vector<18x16xf32> to vector<16x16xf32>
    %37 = arith.addf %35, %36 : vector<16x16xf32>
    %cst_5 = arith.constant 0.111111112 : f32
    %38 = vector.broadcast %cst_5 : f32 to vector<16x16xf32>
    %39 = arith.mulf %37, %38 : vector<16x16xf32>
    %40 = arith.mulf %9, %9 : vector<18x18xf32>
    %41 = vector.extract_strided_slice %40 {offsets = [0, 0], sizes = [18, 16], strides = [1, 1]} : vector<18x18xf32> to vector<18x16xf32>
    %42 = vector.extract_strided_slice %40 {offsets = [0, 1], sizes = [18, 16], strides = [1, 1]} : vector<18x18xf32> to vector<18x16xf32>
    %43 = arith.addf %41, %42 : vector<18x16xf32>
    %44 = vector.extract_strided_slice %40 {offsets = [0, 2], sizes = [18, 16], strides = [1, 1]} : vector<18x18xf32> to vector<18x16xf32>
    %45 = arith.addf %43, %44 : vector<18x16xf32>
    %46 = vector.extract_strided_slice %45 {offsets = [0, 0], sizes = [16, 16], strides = [1, 1]} : vector<18x16xf32> to vector<16x16xf32>
    %47 = vector.extract_strided_slice %45 {offsets = [1, 0], sizes = [16, 16], strides = [1, 1]} : vector<18x16xf32> to vector<16x16xf32>
    %48 = arith.addf %46, %47 : vector<16x16xf32>
    %49 = vector.extract_strided_slice %45 {offsets = [2, 0], sizes = [16, 16], strides = [1, 1]} : vector<18x16xf32> to vector<16x16xf32>
    %50 = arith.addf %48, %49 : vector<16x16xf32>
    %cst_6 = arith.constant 0.111111112 : f32
    %51 = vector.broadcast %cst_6 : f32 to vector<16x16xf32>
    %52 = arith.mulf %50, %51 : vector<16x16xf32>
    %53 = arith.mulf %15, %15 : vector<18x18xf32>
    %54 = vector.extract_strided_slice %53 {offsets = [0, 0], sizes = [18, 16], strides = [1, 1]} : vector<18x18xf32> to vector<18x16xf32>
    %55 = vector.extract_strided_slice %53 {offsets = [0, 1], sizes = [18, 16], strides = [1, 1]} : vector<18x18xf32> to vector<18x16xf32>
    %56 = arith.addf %54, %55 : vector<18x16xf32>
    %57 = vector.extract_strided_slice %53 {offsets = [0, 2], sizes = [18, 16], strides = [1, 1]} : vector<18x18xf32> to vector<18x16xf32>
    %58 = arith.addf %56, %57 : vector<18x16xf32>
    %59 = vector.extract_strided_slice %58 {offsets = [0, 0], sizes = [16, 16], strides = [1, 1]} : vector<18x16xf32> to vector<16x16xf32>
    %60 = vector.extract_strided_slice %58 {offsets = [1, 0], sizes = [16, 16], strides = [1, 1]} : vector<18x16xf32> to vector<16x16xf32>
    %61 = arith.addf %59, %60 : vector<16x16xf32>
    %62 = vector.extract_strided_slice %58 {offsets = [2, 0], sizes = [16, 16], strides = [1, 1]} : vector<18x16xf32> to vector<16x16xf32>
    %63 = arith.addf %61, %62 : vector<16x16xf32>
    %cst_7 = arith.constant 0.111111112 : f32
    %64 = vector.broadcast %cst_7 : f32 to vector<16x16xf32>
    %65 = arith.mulf %63, %64 : vector<16x16xf32>
    %66 = arith.mulf %9, %15 : vector<18x18xf32>
    %67 = vector.extract_strided_slice %66 {offsets = [0, 0], sizes = [18, 16], strides = [1, 1]} : vector<18x18xf32> to vector<18x16xf32>
    %68 = vector.extract_strided_slice %66 {offsets = [0, 1], sizes = [18, 16], strides = [1, 1]} : vector<18x18xf32> to vector<18x16xf32>
    %69 = arith.addf %67, %68 : vector<18x16xf32>
    %70 = vector.extract_strided_slice %66 {offsets = [0, 2], sizes = [18, 16], strides = [1, 1]} : vector<18x18xf32> to vector<18x16xf32>
    %71 = arith.addf %69, %70 : vector<18x16xf32>
    %72 = vector.extract_strided_slice %71 {offsets = [0, 0], sizes = [16, 16], strides = [1, 1]} : vector<18x16xf32> to vector<16x16xf32>
    %73 = vector.extract_strided_slice %71 {offsets = [1, 0], sizes = [16, 16], strides = [1, 1]} : vector<18x16xf32> to vector<16x16xf32>
    %74 = arith.addf %72, %73 : vector<16x16xf32>
    %75 = vector.extract_strided_slice %71 {offsets = [2, 0], sizes = [16, 16], strides = [1, 1]} : vector<18x16xf32> to vector<16x16xf32>
    %76 = arith.addf %74, %75 : vector<16x16xf32>
    %cst_8 = arith.constant 0.111111112 : f32
    %77 = vector.broadcast %cst_8 : f32 to vector<16x16xf32>
    %78 = arith.mulf %76, %77 : vector<16x16xf32>
    %79 = arith.mulf %27, %27 : vector<16x16xf32>
    %80 = arith.subf %52, %79 : vector<16x16xf32>
    %81 = arith.mulf %39, %39 : vector<16x16xf32>
    %82 = arith.subf %65, %81 : vector<16x16xf32>
    %83 = arith.mulf %27, %39 : vector<16x16xf32>
    %84 = arith.subf %78, %83 : vector<16x16xf32>
    %cst_9 = arith.constant 2.000000e+00 : f32
    %85 = vector.broadcast %cst_9 : f32 to vector<16x16xf32>
    %86 = arith.mulf %85, %27 : vector<16x16xf32>
    %87 = arith.mulf %86, %39 : vector<16x16xf32>
    %cst_10 = arith.constant 9.99999974E-5 : f32
    %88 = vector.broadcast %cst_10 : f32 to vector<16x16xf32>
    %89 = arith.addf %87, %88 : vector<16x16xf32>
    %cst_11 = arith.constant 2.000000e+00 : f32
    %90 = vector.broadcast %cst_11 : f32 to vector<16x16xf32>
    %91 = arith.mulf %90, %84 : vector<16x16xf32>
    %cst_12 = arith.constant 8.99999984E-4 : f32
    %92 = vector.broadcast %cst_12 : f32 to vector<16x16xf32>
    %93 = arith.addf %91, %92 : vector<16x16xf32>
    %94 = arith.mulf %89, %93 : vector<16x16xf32>
    %95 = arith.mulf %27, %27 : vector<16x16xf32>
    %96 = arith.mulf %39, %39 : vector<16x16xf32>
    %97 = arith.addf %95, %96 : vector<16x16xf32>
    %cst_13 = arith.constant 9.99999974E-5 : f32
    %98 = vector.broadcast %cst_13 : f32 to vector<16x16xf32>
    %99 = arith.addf %97, %98 : vector<16x16xf32>
    %100 = arith.addf %80, %82 : vector<16x16xf32>
    %cst_14 = arith.constant 8.99999984E-4 : f32
    %101 = vector.broadcast %cst_14 : f32 to vector<16x16xf32>
    %102 = arith.addf %100, %101 : vector<16x16xf32>
    %103 = arith.mulf %99, %102 : vector<16x16xf32>
    %104 = arith.divf %94, %103 : vector<16x16xf32>
    %cst_15 = arith.constant 1.000000e+00 : f32
    %105 = vector.broadcast %cst_15 : f32 to vector<16x16xf32>
    %106 = arith.subf %105, %104 : vector<16x16xf32>
    %cst_16 = arith.constant 5.000000e-01 : f32
    %107 = vector.broadcast %cst_16 : f32 to vector<16x16xf32>
    %108 = arith.mulf %106, %107 : vector<16x16xf32>
    %cst_17 = arith.constant 0.000000e+00 : f32
    %cst_18 = arith.constant 1.000000e+00 : f32
    %109 = vector.broadcast %cst_17 : f32 to vector<16x16xf32>
    %110 = arith.maximumf %109, %108 : vector<16x16xf32>
    %111 = vector.broadcast %cst_18 : f32 to vector<16x16xf32>
    %112 = arith.minimumf %111, %110 : vector<16x16xf32>
    %c0_19 = arith.constant 0 : index
    %c0_20 = arith.constant 0 : index
    %c0_21 = arith.constant 0 : index
    %113 = vector.load %arg3[%c0_19, %c0_20, %c0_21] : memref<1x16x16xf32, #tpu.memory_space<vmem>>, vector<1x16x16xf32>
    %114 = vector.shape_cast %113 : vector<1x16x16xf32> to vector<16x16xf32>
    %115 = vector.shape_cast %112 : vector<16x16xf32> to vector<1x16x16xf32>
    tpu.vector_store %arg3[%c0_19, %c0_20, %c0_21], %115 {strides = array<i32>} : memref<1x16x16xf32, #tpu.memory_space<vmem>>, vector<1x16x16xf32>,
    return
  }
  func.func @transform_0(%arg0: i32) -> (i32, i32, i32) {
    %c0_i32 = arith.constant 0 : i32
    %c0_i32_0 = arith.constant 0 : i32
    %c0_i32_1 = arith.constant 0 : i32
    return %arg0, %c0_i32, %c0_i32_0 : i32, i32, i32
  }
  func.func @transform_1(%arg0: i32) -> (i32, i32, i32) {
    %c0_i32 = arith.constant 0 : i32
    %c0_i32_0 = arith.constant 0 : i32
    %c0_i32_1 = arith.constant 0 : i32
    return %arg0, %c0_i32, %c0_i32_0 : i32, i32, i32
  }
  func.func @transform_2(%arg0: i32) -> (i32, i32, i32) {
    %c0_i32 = arith.constant 0 : i32
    %c0_i32_0 = arith.constant 0 : i32
    %c0_i32_1 = arith.constant 0 : i32
    return %arg0, %c0_i32, %c0_i32_0 : i32, i32, i32
  }
}

</mosaic_0001>

<bundles_post_ra>
// kernel: ssim.1
= control target key start
LH: loop header
LB: loop body
LE: loop exit
PB: predicated region body
PF: predicated region fallthrough
CT: control target
= control target key end

     0   :  { %7 = vsyncpa [#allocation3], 0  ;;  %s1362_s0 = inlined_call_operand.hbm [shape: f32[6,16,16], index: 0, kind: input, shape index: {}]   ;;  %s1363_s1 = inlined_call_operand.hbm [shape: f32[6,16,16], index: 1, kind: input, shape index: {}]   ;;  %s1364_s2 = inlined_call_operand.hbm [shape: f32[6,16,16], index: 2, kind: output, shape index: {}]  }
   0x1   :  { %9 = vsyncpa [#allocation3 + $0x1], 0 }
   0x2   :  { %10 = vsyncpa [#allocation6], 0 }
   0x3   :  { %12 = vsyncpa [#allocation6 + $0x1], 0 }
   0x4   :  { %13 = vsyncpa [#allocation4], 0 }
   0x5   :  { %15 = vsyncpa [#allocation4 + $0x1], 0  ;;  %s967_s9 = smov 0   ;;  %s969_s10 = smov 0  }
   0x6   :  { %s971_s11 = smov 0   ;;  %s973_s12 = smov 0  }
   0x7 LB: > { %s988_s13 = sadd.s32 4294967295, %s939_s12   ;;  %s725_s14 = sadd.s32 4294967294, %s939_s12   ;;  %s939_s12 = sphi %s973_s12, %s1379_s12   ;;  %s935_s11 = sphi %s971_s11, %s1378_s11   ;;  %s931_s10 = sphi %s969_s10, %s1377_s10   ;;  %s927_s9 = sphi %s967_s9, %s1376_s9  }
   0x8   : > { %s992_s15 = sadd.s32 1, %s939_s12   ;;  %s28_s16 = sadd.s32 1, %s935_s11 }
   0x9   : > { %s25_s17 = ssub.s32 %s939_s12, %s992_s15  ;;  %p35_p0 = scmp.ne.s32.totalorder %s935_s11, %s931_s10 }
   0xa   : > { %p26_p1 = scmp.eq.s32.totalorder %s25_s17, 0  ;;  %p36_p2 = scmp.eq.s32.totalorder %s939_s12, 0 }
   0xb   : > { %p41_p3 = scmp.ne.s32.totalorder %s931_s10, %s927_s9  ;;  %p42_p4 = scmp.eq.s32.totalorder %s988_s13, 0 }
   0xc   : > { %s1004_s18 = scalar_select %p26_p1, %s935_s11, %s28_s16  }
   0xd   : > { %p1006_p5 = por %p36_p2, %p35_p0  ;;  %p1010_p6 = por %p42_p4, %p41_p3 }
   0xe   : > { %p91_p7 = scmp.eq.s32.totalorder %s988_s13, 5  ;;  %p97_p8 = scmp.eq.s32.totalorder %s725_s14, 5 }
   0xf   : > { %s1368_s20 = scalar_select %p1010_p6, 1, 0 }
  0x10   : > { %p763_p9 = scmp.lt.s32.totalorder %s939_s12, 6  ;;  %p1016_p10 = por %p91_p7, %p35_p0 }
  0x11   : > { %p1020_p11 = por %p97_p8, %p41_p3  ;;  %s1025_s23 = sand.u32 1, %s935_s11  }
  0x12   : > { %s1369_s21 = scalar_select %p1016_p10, 1, 0 }
  0x13   : > { %s1370_s22 = scalar_select %p1020_p11, 1, 0 }
  0x14   : > { %s743_s24 = sshll.u32 %s939_s12, 8  ;;  %s728_s25 = sshll.u32 %s1025_s23, 4 }
  0x15   : > { %s1034_s28 = scalar_lea.hbm %s1362_s0, %s743_s24  ;;  %s121_s29 = scalar_lea.vmem [#allocation2], %s728_s25 }
  0x16   : > { %s128_s30 = sshll.u32 %s121_s29, 4  ;;  %p1040_p12 = pnand %p763_p9, %p1006_p5  ;;  %s1044_s30 = int_to_ptr.vmem [resolvable:$true] %s128_s30 }
  0x17   : > { %s118_s4 = scalar_lea.sflag [#allocation3], %s1025_s23  ;;  %s809_s5 = scalar_lea.hbm %s1034_s28, 256 }
  0x18   : > { %p810_p13 = scmp.ne.s32.totalorder %s1034_s28, %s809_s5  ;;  %p811_p0 = pneg %p1040_p12 }
  0x19   : > { %s814_s8 = scalar_lea.hbm %s1362_s0, 1536  ;;  %p815_p3 = scmp.lt.u32.totalorder %s1034_s28, %s1362_s0 }
  0x1a   : > { %p812_p1 = pnand %p811_p0, %p810_p13  ;;  %p816_p4 = scmp.lt.u32.totalorder %s814_s8, %s809_s5 }
  0x1b   : > { %p818_p7 = scmp.lt.u32.totalorder %s809_s5, %s1034_s28 }
  0x1c   : > { %p813_p2 = pneg %p812_p1  ;;  %p817_p5 = por %p816_p4, %p815_p3 }
  0x1e   : > { %p819_p8 = por %p818_p7, %p817_p5 }
  0x20   : > { %p820_p9 = pnand %p819_p8, %p813_p2 }
  0x22   : > { %823 = shalt.err (!%p820_p9)
}
  0x23   : > { %s824_s17 = scalar_lea.vmem %s1044_s30, 256  ;;  %s941_s19 = smov [#allocation2]  }
  0x24   : > { %p825_p13 = scmp.ne.s32.totalorder %s1044_s30, %s824_s17  ;;  %s829_s26 = sshll.u32 %s941_s19, 4  ;;  %s830_s26 = int_to_ptr.vmem [resolvable:$false] %s829_s26 }
  0x25   : > { %s831_s27 = scalar_lea.vmem %s830_s26, 512  ;;  %p832_p10 = scmp.lt.s32.totalorder %s1044_s30, %s830_s26 }
  0x26   : > { %p827_p1 = pnand %p825_p13, %p811_p0  ;;  %p833_p3 = scmp.lt.s32.totalorder %s831_s27, %s824_s17 }
  0x28   : > { %p828_p11 = pneg %p827_p1  ;;  %p834_p4 = por %p833_p3, %p832_p10 }
  0x2a   : > { %p835_p5 = pnand %p834_p4, %p828_p11 }
  0x2c   : > { %838 = shalt.err (!%p835_p5)
}
  0x2d   : > { %s942_s29 = smov 128   ;;  %s943_s5 = smov 8  }
  0x2e   : > { %755 = dma.hbm_to_vmem [thread:$0]  (!%p1040_p12), %s1034_s28, 256, %s1044_s30, %s118_s4, %s942_s29, %s942_s29, %s943_s5  }
  0x2f   : > { %p734_p10 = scmp.ge.s32.totalorder %s939_s12, 1  ;;  %p157_p11 = scmp.lt.s32.totalorder %s939_s12, 7 }
  0x30   : > { %s1088_s14 = scalar_lea.hbm %s1363_s1, %s743_s24  ;;  %s142_s16 = scalar_lea.vmem [#allocation5], %s728_s25 }
  0x31   : > { %p1079_p2 = pnand %p734_p10, %p157_p11  ;;  %s149_s17 = sshll.u32 %s142_s16, 4  ;;  %s1092_s17 = int_to_ptr.vmem [resolvable:$true] %s149_s17 }
  0x32   : > { %s139_s28 = scalar_lea.sflag [#allocation6], %s1025_s23  ;;  %s839_s30 = scalar_lea.hbm %s1088_s14, 256 }
  0x33   : > { %p840_p7 = scmp.ne.s32.totalorder %s1088_s14, %s839_s30  ;;  %s844_s24 = scalar_lea.hbm %s1363_s1, 1536 }
  0x34   : > { %p845_p13 = scmp.lt.u32.totalorder %s1088_s14, %s1363_s1  ;;  %p846_p1 = scmp.lt.u32.totalorder %s844_s24, %s839_s30 }
  0x35   : > { %p842_p8 = pnand %p840_p7, %p811_p0  ;;  %p848_p4 = scmp.lt.u32.totalorder %s839_s30, %s1088_s14 }
  0x36   : > { %p847_p3 = por %p846_p1, %p845_p13 }
  0x37   : > { %p843_p9 = pneg %p842_p8 }
  0x38   : > { %p849_p5 = por %p848_p4, %p847_p3 }
  0x3a   : > { %p850_p10 = pnand %p849_p5, %p843_p9 }
  0x3c   : > { %853 = shalt.err (!%p850_p10)
}
  0x3d   : > { %s854_s25 = scalar_lea.vmem %s1092_s17, 256  ;;  %s944_s7 = smov [#allocation5]  }
  0x3e   : > { %p855_p11 = scmp.ne.s32.totalorder %s1092_s17, %s854_s25  ;;  %s859_s8 = sshll.u32 %s944_s7, 4  ;;  %s860_s8 = int_to_ptr.vmem [resolvable:$false] %s859_s8 }
  0x3f   : > { %s861_s16 = scalar_lea.vmem %s860_s8, 512  ;;  %p862_p6 = scmp.lt.s32.totalorder %s1092_s17, %s860_s8 }
  0x40   : > { %p857_p7 = pnand %p855_p11, %p811_p0  ;;  %p863_p13 = scmp.lt.s32.totalorder %s861_s16, %s854_s25 }
  0x42   : > { %p858_p8 = pneg %p857_p7  ;;  %p864_p1 = por %p863_p13, %p862_p6 }
  0x44   : > { %p865_p3 = pnand %p864_p1, %p858_p8 }
  0x46   : > { %868 = shalt.err (!%p865_p3)
}
  0x47   : > { %758 = dma.hbm_to_vmem [thread:$0]  (!%p1040_p12), %s1088_s14, 256, %s1092_s17, %s139_s28, %s942_s29, %s942_s29, %s943_s5  }
  0x48   : > { %161 = sbr.rel (%p1079_p2) target bundleno = 441 (0x1b9), region = 28  ;;  %s1126_s30 = sand.u32 (!%p1079_p2), 1, %s931_s10  }
  0x49   : > { %s1129_s4 = sshll.u32 (!%p1079_p2), %s1126_s30, 4  ;;  %s164_s3 = scalar_lea.sflag (!%p1079_p2), [#allocation3], %s1126_s30 }
  0x4a   : > { %s167_s19 = scalar_lea.vmem (!%p1079_p2), [#allocation2], %s1129_s4  ;;  %p1373_p6 = scmp.ne.s32.totalorder (!%p1079_p2), %s1368_s20, 0 }
  0x4f   : > { %914 = dma.done.wait (%p1373_p6), %s164_s3, 256  }
  0x50   : > { %916 = vsyncadd (%p1373_p6), %s164_s3, 4294967040  ;;  %s173_s23 = scalar_lea.sflag [#allocation6], %s1126_s30  ;;  %s176_s29 = scalar_lea.vmem [#allocation5], %s1129_s4 }
  0x51   : > { %918 = dma.done.wait (%p1373_p6), %s173_s23, 256  }
  0x52   : > { %920 = vsyncadd (%p1373_p6), %s173_s23, 4294967040  ;;  %v203_v0 = vld [vmem:[%s167_s19 + $0x8] sm:$0xff]  ;;  %vm210_vm0 = vcmask 1040384   ;;  %v202_v1 = vld [vmem:[%s167_s19] sm:$0xff]  ;;  %s945_s5 = smov 127   ;;  %s946_s20 = smov 1  }
  0x53   : > { %v212_v2 = vrot.slane %v203_v0, 7  ;;  %v216_v3 = vrot.slane %v203_v0, 5  ;;  %v207_v4 = vrot.slane %v202_v1, 1  ;;  %v211_v5 = vrot.slane %v202_v1, 7  ;;  %v204_v9 = vld [vmem:[%s176_s29] sm:$0xff]  ;;  %v205_v10 = vld [vmem:[%s176_s29 + $0x8] sm:$0xff] }
  0x54   : > { %v261_v11 = vrot.slane %v204_v9, 7  ;;  %v262_v12 = vrot.slane %v205_v10, 7  ;;  %v258_v13 = vrot.slane %v204_v9, 1  ;;  %v266_v16 = vrot.slane %v205_v10, 5  ;;  %s947_s6 = smov 3   ;;  %s948_s14 = smov 126  }
  0x55   : > { %v219_v6 = vsel %vm210_vm0, %v212_v2, %v216_v3  ;;  %v218_v7 = vsel %vm210_vm0, %v207_v4, %v211_v5  ;;  %v213_v8 = vsel %vm210_vm0, %v211_v5, %v212_v2  ;;  %vm249_vm1 = vcmask 7168   ;;  %s745_s17 = sshll.u32 %s988_s13, 8  ;;  %s201_s28 = scalar_lea.vmem [#allocation7], %s1129_s4 }
  0x56   : > { %226 = vrot.lane.b32.xlu1 %v219_v6, %s945_s5  ;;  %222 = vrot.lane.b32.xlu0 %v218_v7, %s945_s5  ;;  %v263_v14 = vsel %vm210_vm0, %v261_v11, %v262_v12  ;;  %v268_v15 = vsel %vm210_vm0, %v258_v13, %v261_v11  ;;  %v269_v17 = vsel %vm210_vm0, %v262_v12, %v266_v16  ;;  %vm253_vm2 = vcmask 138240   ;;  %s629_s24 = sshll.u32 %s201_s28, 4  ;;  %s1317_s25 = scalar_lea.hbm %s1364_s2, %s745_s17  ;;  %s1319_s24 = int_to_ptr.vmem [resolvable:$true] %s629_s24 }
  0x57   : > { %vm335_vm3 = vcmask 1046528   ;;  %vm345_vm4 = vcmask 1045504   ;;  %vm612_vm5 = vcmask 130048   ;;  %s616_s13 = scalar_lea.sflag [#allocation4], %s1126_s30  ;;  %s869_s7 = scalar_lea.vmem %s1319_s24, 256 }
  0x58   : > { %p870_p12 = scmp.ne.s32.totalorder %s1319_s24, %s869_s7  ;;  %p1374_p0 = scmp.ne.s32.totalorder %s1369_s21, 0 }
  0x59   : > { %s949_s8 = smov [#allocation7]  }
  0x5a   : > { %231 = vrot.lane.b32.xlu1 %v218_v7, %s946_s20  ;;  %224 = vrot.lane.b32.xlu0 %v213_v8, %s945_s5  ;;  %p871_p2 = pnand %p870_p12, %p1374_p0  ;;  %s873_s16 = sshll.u32 %s949_s8, 4  ;;  %s874_s16 = int_to_ptr.vmem [resolvable:$false] %s873_s16 }
  0x5b   : > { %s875_s4 = scalar_lea.vmem %s874_s16, 512  ;;  %p876_p4 = scmp.lt.s32.totalorder %s1319_s24, %s874_s16 }
  0x5c   : > { %p872_p9 = pneg %p871_p2  ;;  %p877_p5 = scmp.lt.s32.totalorder %s875_s4, %s869_s7 }
  0x5e   : > { %235 = vrot.lane.b32.xlu1 %v219_v6, %s946_s20  ;;  %233 = vrot.lane.b32.xlu0 %v213_v8, %s946_s20  ;;  %p878_p10 = por %p877_p5, %p876_p4 }
  0x60   : > { %p879_p11 = pnand %p878_p10, %p872_p9 }
  0x62   : > { %274 = vrot.lane.b32.xlu1 %v263_v14, %s945_s5  ;;  %272 = vrot.lane.b32.xlu0 %v268_v15, %s945_s5 }
  0x66   : > { %281 = vrot.lane.b32.xlu1 %v268_v15, %s946_s20  ;;  %276 = vrot.lane.b32.xlu0 %v269_v17, %s945_s5 }
  0x6a   : > { %285 = vrot.lane.b32.xlu1 %v269_v17, %s946_s20  ;;  %283 = vrot.lane.b32.xlu0 %v263_v14, %s946_s20 }
  0x6e   : > { %242 = vrot.lane.b32.xlu1 %v213_v8, %s947_s6  ;;  %240 = vrot.lane.b32.xlu0 %v218_v7, %s947_s6 }
  0x72   : > { %290 = vrot.lane.b32.xlu1 %v268_v15, %s947_s6  ;;  %244 = vrot.lane.b32.xlu0 %v219_v6, %s947_s6 }
  0x76   : > { %294 = vrot.lane.b32.xlu1 %v269_v17, %s947_s6  ;;  %292 = vrot.lane.b32.xlu0 %v263_v14, %s947_s6 }
  0xc8   : > { %v227_v18 = vpop.permute.xlu1 %226  ;;  %v223_v19 = vpop.permute.xlu0 %222 }
  0xcc   : > { %v232_v20 = vpop.permute.xlu1 %231  ;;  %v225_v21 = vpop.permute.xlu0 %224 }
  0xcd   : > { %v250_v30 = vsel %vm249_vm1, %v223_v19, %v232_v20 }
  0xd0   : > { %v236_v22 = vpop.permute.xlu1 %235  ;;  %v234_v23 = vpop.permute.xlu0 %233 }
  0xd1   : > { %v251_v31 = vsel %vm249_vm1, %v225_v21, %v234_v23  ;;  %v252_v36 = vsel %vm249_vm1, %v227_v18, %v236_v22 }
  0xd4   : > { %v275_v24 = vpop.permute.xlu1 %274  ;;  %v273_v25 = vpop.permute.xlu0 %272 }
  0xd8   : > { %v282_v26 = vpop.permute.xlu1 %281  ;;  %v277_v27 = vpop.permute.xlu0 %276 }
  0xd9   : > { %v299_v37 = vsel %vm249_vm1, %v273_v25, %v282_v26 }
  0xdc   : > { %v286_v28 = vpop.permute.xlu1 %285  ;;  %v284_v29 = vpop.permute.xlu0 %283 }
  0xdd   : > { %v301_v42 = vsel %vm249_vm1, %v277_v27, %v286_v28  ;;  %v300_v43 = vsel %vm249_vm1, %v275_v24, %v284_v29 }
  0xe0   : > { %v243_v32 = vpop.permute.xlu1 %242  ;;  %v241_v33 = vpop.permute.xlu0 %240 }
  0xe1   : > { %v1158_v34 = vsel %vm253_vm2, %v251_v31, %v243_v32  ;;  %v1161_v35 = vsel %vm253_vm2, %v250_v30, %v241_v33 }
  0xe2   : > { %310 = vrot.lane.b32.xlu1 %v1158_v34, %s945_s5  ;;  %308 = vrot.lane.b32.xlu0 %v1161_v35, %s945_s5  ;;  %v1197_v48 = vmul.f32 %v1158_v34, %v1158_v34  ;;  %v1201_v49 = vmul.f32 %v1161_v35, %v1161_v35 }
  0xe4   : > { %v291_v38 = vpop.permute.xlu1 %290  ;;  %v245_v39 = vpop.permute.xlu0 %244 }
  0xe5   : > { %v1170_v40 = vsel %vm253_vm2, %v299_v37, %v291_v38  ;;  %v1173_v41 = vsel %vm253_vm2, %v252_v36, %v245_v39 }
  0xe6   : > { %360 = vrot.lane.b32.xlu1 %v1170_v40, %s945_s5  ;;  %312 = vrot.lane.b32.xlu0 %v1173_v41, %s945_s5  ;;  %v1209_v50 = vmul.f32 %v1170_v40, %v1170_v40  ;;  %v1213_v51 = vmul.f32 %v1173_v41, %v1173_v41  ;;  %v1244_v55 = vmul.f32 %v1170_v40, %v1161_v35 }
  0xe8   : > { %v295_v44 = vpop.permute.xlu1 %294  ;;  %v293_v45 = vpop.permute.xlu0 %292 }
  0xe9   : > { %v304_v46 = vsel %vm253_vm2, %v301_v42, %v295_v44  ;;  %v303_v47 = vsel %vm253_vm2, %v300_v43, %v293_v45 }
  0xea   : > { %364 = vrot.lane.b32.xlu1 %v304_v46, %s945_s5  ;;  %362 = vrot.lane.b32.xlu0 %v303_v47, %s945_s5  ;;  %v1219_v52 = vmul.f32 %v304_v46, %v304_v46  ;;  %v1221_v53 = vmul.f32 %v303_v47, %v303_v47  ;;  %v1240_v54 = vmul.f32 %v303_v47, %v1158_v34 }
  0xeb   : > { %v1251_v56 = vmul.f32 %v304_v46, %v1173_v41 }
  0xee   : > { %322 = vrot.lane.b32.xlu1 %v1158_v34, %s948_s14  ;;  %320 = vrot.lane.b32.xlu0 %v1161_v35, %s948_s14 }
  0xf2   : > { %372 = vrot.lane.b32.xlu1 %v1170_v40, %s948_s14  ;;  %324 = vrot.lane.b32.xlu0 %v1173_v41, %s948_s14 }
  0xf6   : > { %376 = vrot.lane.b32.xlu1 %v304_v46, %s948_s14  ;;  %374 = vrot.lane.b32.xlu0 %v303_v47, %s948_s14 }
  0xfa   : > { %415 = vrot.lane.b32.xlu1 %v1197_v48, %s945_s5  ;;  %413 = vrot.lane.b32.xlu0 %v1201_v49, %s945_s5 }
  0xfe   : > { %466 = vrot.lane.b32.xlu1 %v1209_v50, %s945_s5  ;;  %417 = vrot.lane.b32.xlu0 %v1213_v51, %s945_s5 }
 0x102   : > { %470 = vrot.lane.b32.xlu1 %v1219_v52, %s945_s5  ;;  %468 = vrot.lane.b32.xlu0 %v1221_v53, %s945_s5 }
 0x106   : > { %427 = vrot.lane.b32.xlu1 %v1197_v48, %s948_s14  ;;  %425 = vrot.lane.b32.xlu0 %v1201_v49, %s948_s14 }
 0x10a   : > { %478 = vrot.lane.b32.xlu1 %v1209_v50, %s948_s14  ;;  %429 = vrot.lane.b32.xlu0 %v1213_v51, %s948_s14 }
 0x10e   : > { %482 = vrot.lane.b32.xlu1 %v1219_v52, %s948_s14  ;;  %480 = vrot.lane.b32.xlu0 %v1221_v53, %s948_s14 }
 0x112   : > { %521 = vrot.lane.b32.xlu1 %v1240_v54, %s945_s5  ;;  %519 = vrot.lane.b32.xlu0 %v1244_v55, %s945_s5 }
 0x116   : > { %531 = vrot.lane.b32.xlu1 %v1244_v55, %s948_s14  ;;  %523 = vrot.lane.b32.xlu0 %v1251_v56, %s945_s5 }
 0x11a   : > { %535 = vrot.lane.b32.xlu1 %v1251_v56, %s948_s14  ;;  %533 = vrot.lane.b32.xlu0 %v1240_v54, %s948_s14 }
 0x154   : > { %v311_v57 = vpop.permute.xlu1 %310  ;;  %v309_v58 = vpop.permute.xlu0 %308 }
 0x155   : > { %v318_v5 = vadd.f32 %v311_v57, %v1158_v34  ;;  %v317_v6 = vadd.f32 %v309_v58, %v1161_v35 }
 0x158   : > { %v361_v59 = vpop.permute.xlu1 %360  ;;  %v313_v60 = vpop.permute.xlu0 %312 }
 0x159   : > { %v369_v13 = vadd.f32 %v361_v59, %v1170_v40  ;;  %v319_v16 = vadd.f32 %v313_v60, %v1173_v41 }
 0x15c   : > { %v365_v61 = vpop.permute.xlu1 %364  ;;  %v363_v62 = vpop.permute.xlu0 %362 }
 0x15d   : > { %v371_v7 = vadd.f32 %v365_v61, %v304_v46  ;;  %v370_v8 = vadd.f32 %v363_v62, %v303_v47 }
 0x160   : > { %v323_v63 = vpop.permute.xlu1 %322  ;;  %v321_v0 = vpop.permute.xlu0 %320 }
 0x161   : > { %v330_v9 = vadd.f32 %v323_v63, %v318_v5  ;;  %v329_v10 = vadd.f32 %v321_v0, %v317_v6 }
 0x163   : > { %v337_v17 = vrot.slane %v330_v9, 1  ;;  %v336_v18 = vrot.slane %v329_v10, 1  ;;  %v347_v27 = vrot.slane %v330_v9, 2  ;;  %v346_v30 = vrot.slane %v329_v10, 2 }
 0x164   : > { %v373_v1 = vpop.permute.xlu1 %372  ;;  %v325_v2 = vpop.permute.xlu0 %324 }
 0x165   : > { %v381_v19 = vadd.f32 %v373_v1, %v369_v13  ;;  %v331_v22 = vadd.f32 %v325_v2, %v319_v16  ;;  %v338_v25 = vsel %vm335_vm3, %v336_v18, %v337_v17  ;;  %v348_v44 = vsel %vm345_vm4, %v346_v30, %v347_v27 }
 0x166   : > { %v343_v34 = vadd.f32 %v338_v25, %v329_v10 }
 0x167   : > { %v387_v26 = vrot.slane %v381_v19, 1  ;;  %v339_v31 = vrot.slane %v331_v22, 1  ;;  %v396_v39 = vrot.slane %v381_v19, 2  ;;  %v349_v58 = vrot.slane %v331_v22, 2 }
 0x168   : > { %v377_v3 = vpop.permute.xlu1 %376  ;;  %v375_v4 = vpop.permute.xlu0 %374  ;;  %v353_v57 = vadd.f32 %v348_v44, %v343_v34 }
 0x169   : > { %v383_v14 = vadd.f32 %v377_v3, %v371_v7  ;;  %v382_v15 = vadd.f32 %v375_v4, %v370_v8  ;;  %v340_v45 = vsel %vm335_vm3, %v337_v17, %v339_v31  ;;  %v350_v8 = vsel %vm345_vm4, %v347_v27, %v349_v58 }
 0x16a   : > { %v344_v62 = vadd.f32 %v340_v45, %v330_v9 }
 0x16b   : > { %v390_v23 = vrot.slane %v383_v14, 1  ;;  %v388_v24 = vrot.slane %v382_v15, 1  ;;  %v397_v35 = vrot.slane %v382_v15, 2  ;;  %v399_v36 = vrot.slane %v383_v14, 2 }
 0x16c   : > { %v416_v11 = vpop.permute.xlu1 %415  ;;  %v414_v12 = vpop.permute.xlu0 %413  ;;  %v1280_v14 = vmul.f32 0.11111111, %v353_v57 }
 0x16d   : > { %v389_v32 = vsel %vm335_vm3, %v387_v26, %v388_v24  ;;  %v391_v33 = vsel %vm335_vm3, %v388_v24, %v390_v23  ;;  %v423_v37 = vadd.f32 %v416_v11, %v1197_v48  ;;  %v422_v38 = vadd.f32 %v414_v12, %v1201_v49 }
 0x16e   : > { %v394_v40 = vadd.f32 %v389_v32, %v381_v19  ;;  %v395_v41 = vadd.f32 %v391_v33, %v382_v15  ;;  %v398_v59 = vsel %vm345_vm4, %v396_v39, %v397_v35  ;;  %v400_v60 = vsel %vm345_vm4, %v397_v35, %v399_v36 }
 0x16f   : > { %v566_v36 = vmul.f32 %v1280_v14, %v1280_v14 }
 0x170   : > { %v467_v20 = vpop.permute.xlu1 %466  ;;  %v418_v21 = vpop.permute.xlu0 %417  ;;  %v403_v63 = vadd.f32 %v398_v59, %v394_v40  ;;  %v404_v0 = vadd.f32 %v400_v60, %v395_v41 }
 0x171   : > { %v424_v48 = vadd.f32 %v418_v21, %v1213_v51  ;;  %v475_v1 = vadd.f32 %v467_v20, %v1209_v50  ;;  %v354_v50 = vadd.f32 %v350_v8, %v344_v62 }
 0x172   : > { %v1282_v15 = vmul.f32 0.11111111, %v403_v63  ;;  %v1284_v16 = vmul.f32 0.11111111, %v404_v0 }
 0x173   : > { %v356_v32 = vmul.f32 0.11111111, %v354_v50 }
 0x174   : > { %v471_v28 = vpop.permute.xlu1 %470  ;;  %v469_v29 = vpop.permute.xlu0 %468  ;;  %v571_v41 = vmul.f32 %v1284_v16, %v1284_v16 }
 0x175   : > { %v477_v51 = vadd.f32 %v471_v28, %v1219_v52  ;;  %v476_v12 = vadd.f32 %v469_v29, %v1221_v53  ;;  %v567_v59 = vmul.f32 %v356_v32, %v356_v32 }
 0x177   : > { %v591_v62 = vadd.f32 %v571_v41, %v567_v59 }
 0x178   : > { %v428_v42 = vpop.permute.xlu1 %427  ;;  %v426_v43 = vpop.permute.xlu0 %425 }
 0x179   : > { %v435_v46 = vadd.f32 %v428_v42, %v423_v37  ;;  %v434_v47 = vadd.f32 %v426_v43, %v422_v38  ;;  %v570_v37 = vmul.f32 %v1282_v15, %v1282_v15 }
 0x17b   : > { %v441_v49 = vrot.slane %v435_v46, 1  ;;  %v440_v61 = vrot.slane %v434_v47, 1  ;;  %v450_v4 = vrot.slane %v435_v46, 2  ;;  %v449_v6 = vrot.slane %v434_v47, 2 }
 0x17c   : > { %v479_v2 = vpop.permute.xlu1 %478  ;;  %v430_v3 = vpop.permute.xlu0 %429  ;;  %v590_v60 = vadd.f32 %v570_v37, %v566_v36 }
 0x17d   : > { %v442_v5 = vsel %vm335_vm3, %v440_v61, %v441_v49  ;;  %v436_v7 = vadd.f32 %v430_v3, %v424_v48  ;;  %v487_v11 = vadd.f32 %v479_v2, %v475_v1  ;;  %v451_v19 = vsel %vm345_vm4, %v449_v6, %v450_v4 }
 0x17e   : > { %v447_v10 = vadd.f32 %v442_v5, %v434_v47  ;;  %v592_v8 = vadd.f32 0.0001, %v590_v60 }
 0x17f   : > { %v443_v9 = vrot.slane %v436_v7, 1  ;;  %v452_v13 = vrot.slane %v436_v7, 2  ;;  %v493_v23 = vrot.slane %v487_v11, 1  ;;  %v502_v33 = vrot.slane %v487_v11, 2 }
 0x180   : > { %v483_v17 = vpop.permute.xlu1 %482  ;;  %v481_v18 = vpop.permute.xlu0 %480  ;;  %v456_v52 = vadd.f32 %v451_v19, %v447_v10 }
 0x181   : > { %v444_v20 = vsel %vm335_vm3, %v441_v49, %v443_v9  ;;  %v489_v21 = vadd.f32 %v483_v17, %v477_v51  ;;  %v488_v22 = vadd.f32 %v481_v18, %v476_v12  ;;  %v453_v24 = vsel %vm345_vm4, %v450_v4, %v452_v13 }
 0x182   : > { %v448_v53 = vadd.f32 %v444_v20, %v435_v46  ;;  %v458_v40 = vmul.f32 0.11111111, %v456_v52  ;;  %v593_v17 = vadd.f32 0.0001, %v591_v62 }
 0x183   : > { %v496_v25 = vrot.slane %v489_v21, 1  ;;  %v505_v26 = vrot.slane %v489_v21, 2  ;;  %v494_v27 = vrot.slane %v488_v22, 1  ;;  %v503_v28 = vrot.slane %v488_v22, 2 }
 0x184   : > { %v457_v29 = vadd.f32 %v453_v24, %v448_v53  ;;  %v522_v30 = vpop.permute.xlu1 %521  ;;  %v520_v31 = vpop.permute.xlu0 %519  ;;  %v568_v1 = vsub.f32 %v458_v40, %v566_v36 }
 0x185   : > { %v495_v34 = vsel %vm335_vm3, %v493_v23, %v494_v27  ;;  %v497_v35 = vsel %vm335_vm3, %v494_v27, %v496_v25  ;;  %v504_v42 = vsel %vm345_vm4, %v502_v33, %v503_v28  ;;  %v506_v43 = vsel %vm345_vm4, %v503_v28, %v505_v26 }
 0x186   : > { %v500_v38 = vadd.f32 %v495_v34, %v487_v11  ;;  %v501_v39 = vadd.f32 %v497_v35, %v488_v22  ;;  %v459_v44 = vmul.f32 0.11111111, %v457_v29  ;;  %v528_v47 = vadd.f32 %v520_v31, %v1244_v55 }
 0x187   : > { %v529_v63 = vadd.f32 %v522_v30, %v1240_v54  ;;  %v578_v27 = vmul.f32 2.0, %v1280_v14  ;;  %v579_v28 = vmul.f32 2.0, %v356_v32  ;;  %v574_v29 = vmul.f32 %v1282_v15, %v1280_v14 }
 0x188   : > { %v509_v45 = vadd.f32 %v504_v42, %v500_v38  ;;  %v510_v46 = vadd.f32 %v506_v43, %v501_v39  ;;  %v532_v57 = vpop.permute.xlu1 %531  ;;  %v524_v58 = vpop.permute.xlu0 %523  ;;  %v569_v2 = vsub.f32 %v459_v44, %v567_v59  ;;  %v575_v30 = vmul.f32 %v1284_v16, %v356_v32 }
 0x189   : > { %v540_v61 = vadd.f32 %v532_v57, %v528_v47  ;;  %v530_v0 = vadd.f32 %v524_v58, %v1251_v56  ;;  %v580_v34 = vmul.f32 %v578_v27, %v1282_v15  ;;  %v581_v35 = vmul.f32 %v579_v28, %v1284_v16 }
 0x18a   : > { %v511_v48 = vmul.f32 0.11111111, %v509_v45  ;;  %v512_v49 = vmul.f32 0.11111111, %v510_v46 }
 0x18b   : > { %v546_v51 = vrot.slane %v540_v61, 1  ;;  %v555_v56 = vrot.slane %v540_v61, 2  ;;  %v582_v40 = vadd.f32 0.0001, %v580_v34 }
 0x18c   : > { %v572_v3 = vsub.f32 %v511_v48, %v570_v37  ;;  %v573_v4 = vsub.f32 %v512_v49, %v571_v41  ;;  %v536_v5 = vpop.permute.xlu1 %535  ;;  %v534_v6 = vpop.permute.xlu0 %533  ;;  %v583_v41 = vadd.f32 0.0001, %v581_v35 }
 0x18d   : > { %v542_v7 = vadd.f32 %v536_v5, %v530_v0  ;;  %v541_v55 = vadd.f32 %v534_v6, %v529_v63 }
 0x18e   : > { %v594_v10 = vadd.f32 %v572_v3, %v568_v1  ;;  %v595_v11 = vadd.f32 %v573_v4, %v569_v2 }
 0x18f   : > { %v549_v12 = vrot.slane %v542_v7, 1  ;;  %v558_v9 = vrot.slane %v542_v7, 2  ;;  %v547_v13 = vrot.slane %v541_v55, 1  ;;  %v556_v50 = vrot.slane %v541_v55, 2 }
 0x190   : > { %v596_v54 = vadd.f32 0.0009, %v594_v10  ;;  %v597_v18 = vadd.f32 0.0009, %v595_v11 }
 0x191   : > { %v548_v19 = vsel %vm335_vm3, %v546_v51, %v547_v13  ;;  %v550_v20 = vsel %vm335_vm3, %v547_v13, %v549_v12  ;;  %v557_v53 = vsel %vm345_vm4, %v555_v56, %v556_v50  ;;  %v559_v24 = vsel %vm345_vm4, %v556_v50, %v558_v9 }
 0x192   : > { %v598_v21 = vmul.f32 %v596_v54, %v592_v8  ;;  %v599_v22 = vmul.f32 %v597_v18, %v593_v17  ;;  %v553_v52 = vadd.f32 %v548_v19, %v540_v61  ;;  %v554_v23 = vadd.f32 %v550_v20, %v541_v55 }
 0x194   : > { %805 = vrcp.f32 %v598_v21  ;;  %v562_v25 = vadd.f32 %v557_v53, %v553_v52  ;;  %v563_v26 = vadd.f32 %v559_v24, %v554_v23 }
 0x195   : > { %807 = vrcp.f32 %v599_v22 }
 0x196   : > { %v564_v31 = vmul.f32 0.11111111, %v562_v25  ;;  %v565_v33 = vmul.f32 0.11111111, %v563_v26 }
 0x198   : > { %v576_v36 = vsub.f32 %v564_v31, %v574_v29  ;;  %v577_v37 = vsub.f32 %v565_v33, %v575_v30 }
 0x19a   : > { %v584_v38 = vmul.f32 2.0, %v576_v36  ;;  %v585_v39 = vmul.f32 2.0, %v577_v37 }
 0x19c   : > { %v586_v42 = vadd.f32 0.0009, %v584_v38  ;;  %v587_v43 = vadd.f32 0.0009, %v585_v39 }
 0x19e   : > { %v806_v44 = vpop.eup %805  ;;  %v588_v14 = vmul.f32 %v586_v42, %v582_v40  ;;  %v589_v45 = vmul.f32 %v587_v43, %v583_v41 }
 0x19f   : > { %v808_v32 = vpop.eup %807 }
 0x1a0   : > { %v601_v46 = vmul.f32 %v806_v44, %v588_v14  ;;  %v603_v47 = vmul.f32 %v808_v32, %v589_v45 }
 0x1a2   : > { %v604_v57 = vsub.f32 1.0, %v601_v46  ;;  %v605_v15 = vsub.f32 1.0, %v603_v47 }
 0x1a4   : > { %v606_v16 = vmul.f32 0.5, %v604_v57  ;;  %v607_v58 = vmul.f32 0.5, %v605_v15 }
 0x1a6   : > { %v608_v59 = vmax.f32 %v606_v16, 0.0  ;;  %v609_v60 = vmax.f32 %v607_v58, 0.0 }
 0x1a8   : > { %v610_v48 = vmin.f32 %v608_v59, 1.0  ;;  %v611_v49 = vmin.f32 %v609_v60, 1.0 }
 0x1aa   : > { %613 = vst.msk [vmem:[%s201_s28] sm:$0xff] %vm612_vm5, %v610_v48  ;;  %614 = vst.msk [vmem:[%s201_s28 + $0x8] sm:$0xff] %vm612_vm5, %v611_v49 }
 0x1ab   : > { %882 = shalt.err (!%p879_p11)
}
 0x1ac   : > { %s883_s3 = scalar_lea.hbm %s1317_s25, 256  ;;  %s887_s29 = scalar_lea.hbm %s1364_s2, 1536 }
 0x1ad   : > { %p884_p7 = scmp.ne.s32.totalorder %s1317_s25, %s883_s3  ;;  %p888_p1 = scmp.lt.u32.totalorder %s1317_s25, %s1364_s2 }
 0x1ae   : > { %p889_p3 = scmp.lt.u32.totalorder %s887_s29, %s883_s3  ;;  %p891_p12 = scmp.lt.u32.totalorder %s883_s3, %s1317_s25 }
 0x1af   : > { %p885_p8 = pnand %p884_p7, %p1374_p0 }
 0x1b0   : > { %p890_p6 = por %p889_p3, %p888_p1 }
 0x1b1   : > { %p886_p13 = pneg %p885_p8 }
 0x1b2   : > { %p892_p2 = por %p891_p12, %p890_p6 }
 0x1b4   : > { %p893_p9 = pnand %p892_p2, %p886_p13 }
 0x1b6   : > { %896 = shalt.err (!%p893_p9)
}
 0x1b7   : > { %s950_s6 = smov 128   ;;  %s951_s14 = smov 8  }
 0x1b8   : > { %750 = dma.vmem_to_hbm [thread:$0]  (%p1374_p0), %s1319_s24, 256, %s1317_s25, %s616_s13, %s950_s6, %s950_s6, %s951_s14  }
 0x1b9 PF: > { %p764_p4 = scmp.ge.s32.totalorder %s939_s12, 2  ;;  %s644_s17 = sand.u32 1, %s927_s9  }
 0x1ba   : > { %p1375_p5 = scmp.ne.s32.totalorder %s1370_s22, 0  ;;  %s645_s28 = scalar_lea.sflag [#allocation4], %s644_s17 }
 0x1bc   : > { %p760_p10 = pnand %p764_p4, %p1375_p5 }
 0x1be   : > { %922 = dma.done.wait (!%p760_p10), %s645_s28, 256  }
 0x1bf   : > { %924 = vsyncadd (!%p760_p10), %s645_s28, 4294967040  ;;  %p18_p11 = scmp.ge.s32.totalorder %s992_s15, 8   ;;  %s1376_s9 = smov %s931_s10 }
 0x1c0   : > { %s1377_s10 = smov %s935_s11  ;;  %s1378_s11 = smov %s1004_s18 }
 0x1c1   : > { %s1379_s12 = smov %s992_s15  ;;  %20 = sbr.rel (!%p18_p11) target bundleno = 7 (0x7), region = 86 }
 0x1c8   :  { %650 = vsyncpa [#allocation3], 1 }
 0x1c9   :  { %652 = vsyncpa [#allocation3 + $0x1], 1 }
 0x1ca   :  { %653 = vsyncpa [#allocation6], 1 }
 0x1cb   :  { %655 = vsyncpa [#allocation6 + $0x1], 1 }
 0x1cc   :  { %656 = vsyncpa [#allocation4], 1 }
 0x1cd   :  { %658 = vsyncpa [#allocation4 + $0x1], 1 }

</bundles_post_ra>
